<compile_context>
chip_gen: v7x
topology: tpu7x:2x2x1
jax: 0.10.0
libtpu: 0.0.40
codegen_flags: <defaults>
</compile_context>

<pallas_src>
import jax
import jax.numpy as jnp
from jax.experimental import pallas as pl
from jax.experimental.pallas import tpu as pltpu

IN_F = 784
H1 = 128
H2 = 64
OUT_F = 10


def mlp_kernel(x_ref, w1_ref, b1_ref, w2_ref, b2_ref, w3_ref, b3_ref, o_ref):
    # x arrives as raw f32; cast to bf16 in-kernel (VPU) -> no extra wrapper pass.
    x = x_ref[...].astype(jnp.bfloat16)
    # fc1 + relu (bf16 operands, f32 accumulation)
    h1 = jnp.dot(x, w1_ref[...], preferred_element_type=jnp.float32)
    h1 = jnp.maximum(h1 + b1_ref[...], 0.0).astype(jnp.bfloat16)
    # fc2 + relu
    h2 = jnp.dot(h1, w2_ref[...], preferred_element_type=jnp.float32)
    h2 = jnp.maximum(h2 + b2_ref[...], 0.0).astype(jnp.bfloat16)
    # fc3
    logits = jnp.dot(h2, w3_ref[...], preferred_element_type=jnp.float32)
    logits = logits + b3_ref[...]
    # numerically stable softmax over the class axis; denominator via EUP vrcp
    m = jnp.max(logits, axis=-1, keepdims=True)
    e = jnp.exp(logits - m)
    inv = pl.reciprocal(jnp.sum(e, axis=-1, keepdims=True), approx=True)
    o_ref[...] = (e * inv).astype(o_ref.dtype)


def prep_params(w1, b1, w2, b2, w3, b3):
    """One-time parameter prep (hoisted out of the forward path)."""
    w1b = w1.astype(jnp.bfloat16)
    w2b = w2.astype(jnp.bfloat16)
    w3b = w3.astype(jnp.bfloat16)
    # Biases as (1, N) f32 rows so they broadcast onto the f32 accumulators.
    b1r = b1.reshape((1, -1)).astype(jnp.float32)
    b2r = b2.reshape((1, -1)).astype(jnp.float32)
    b3r = b3.reshape((1, -1)).astype(jnp.float32)
    return (w1b, b1r, w2b, b2r, w3b, b3r)


def _round_up(n, m):
    return ((n + m - 1) // m) * m


def _pick_tb(batch):
    # Tiny batch: single full-array block (no padded rows, no wasted MXU work).
    if batch <= 8:
        return batch
    # Larger batches: big tiles amortize the ~0.35 us per-grid-step overhead,
    # but keep >=2 grid steps so the "parallel" axis can feed both v7x TCs.
    # TB=1024 keeps the double-buffered f32 x tile ~6.4 MiB, well under the
    # 16/32/32 MiB default scoped VMEM on v5e/v6e/v7x.
    return min(1024, _round_up(pl.cdiv(batch, 2), 8))


def mlp_forward(x, prepped):
    w1b, b1r, w2b, b2r, w3b, b3r = prepped
    B = x.shape[0]
    x2d = x.reshape((B, IN_F))  # metadata-only reshape; keep f32, cast in-kernel

    tb = _pick_tb(B)
    grid = (pl.cdiv(B, tb),)

    resident = lambda arr: pl.BlockSpec(arr.shape, lambda i: (0,) * arr.ndim)

    flops = 2 * B * (IN_F * H1 + H1 * H2 + H2 * OUT_F)
    bytes_accessed = (
        B * IN_F * x2d.dtype.itemsize
        + sum(int(a.size) * a.dtype.itemsize for a in prepped)
        + B * OUT_F * 4
    )

    out = pl.pallas_call(
        mlp_kernel,
        out_shape=jax.ShapeDtypeStruct((B, OUT_F), jnp.float32),
        grid=grid,
        in_specs=[
            pl.BlockSpec((tb, IN_F), lambda i: (i, 0)),  # x: tiled over batch
            resident(w1b),                               # weights stay resident
            resident(b1r),
            resident(w2b),
            resident(b2r),
            resident(w3b),
            resident(b3r),
        ],
        out_specs=pl.BlockSpec((tb, OUT_F), lambda i: (i, 0)),
        compiler_params=pltpu.CompilerParams(
            dimension_semantics=("parallel",),
        ),
        cost_estimate=pl.CostEstimate(
            flops=flops,
            transcendentals=B * (OUT_F + 1),
            bytes_accessed=bytes_accessed,
        ),
    )(x2d, w1b, b1r, w2b, b2r, w3b, b3r)

    return out


def init_params(key):
    k1, k2, k3 = jax.random.split(key, 3)

    # Deterministic synthetic init (uniform +-1/sqrt(fan_in), like torch Linear).
    def lin(k, fan_in, fan_out):
        kw, kb = jax.random.split(k)
        bound = 1.0 / jnp.sqrt(fan_in)
        w = jax.random.uniform(kw, (fan_in, fan_out), jnp.float32, -bound, bound)
        b = jax.random.uniform(kb, (fan_out,), jnp.float32, -bound, bound)
        return w, b

    w1, b1 = lin(k1, IN_F, H1)
    w2, b2 = lin(k2, H1, H2)
    w3, b3 = lin(k3, H2, OUT_F)
    return w1, b1, w2, b2, w3, b3


def ref_forward(x, w1, b1, w2, b2, w3, b3):
    # Pure-JAX reference with matching bf16 operand / f32 accumulate precision.
    xf = x.reshape((x.shape[0], IN_F)).astype(jnp.bfloat16)
    h1 = jnp.dot(xf, w1.astype(jnp.bfloat16), preferred_element_type=jnp.float32)
    h1 = jnp.maximum(h1 + b1, 0.0).astype(jnp.bfloat16)
    h2 = jnp.dot(h1, w2.astype(jnp.bfloat16), preferred_element_type=jnp.float32)
    h2 = jnp.maximum(h2 + b2, 0.0).astype(jnp.bfloat16)
    logits = jnp.dot(h2, w3.astype(jnp.bfloat16), preferred_element_type=jnp.float32)
    logits = logits + b3
    return jax.nn.softmax(logits, axis=1)


if __name__ == "__main__":
    key = jax.random.PRNGKey(0)
    kx, kp = jax.random.split(key)

    # Small batch of MNIST-like inputs: (B, 1, 28, 28) -> flattened to 784.
    B = 8
    x = jax.random.normal(kx, (B, 1, 28, 28), dtype=jnp.float32)

    params = init_params(kp)
    prepped = prep_params(*params)  # one-time weight prep, outside the fwd path

    out = mlp_forward(x, prepped)
    out = jax.block_until_ready(out)

    ref = ref_forward(x, *params)

    assert out.shape == (B, OUT_F)
    # bf16 matmuls + approx reciprocal -> slightly looser tolerance than pure f32.
    assert jnp.allclose(out, ref, atol=5e-3, rtol=5e-3), "mismatch vs reference"
    assert jnp.allclose(jnp.sum(out, axis=1), 1.0, atol=5e-3), "softmax rows != 1"

    print("KERNEL_OK")
</pallas_src>

<mosaic_0001>
module attributes {stable_mosaic.version = 11 : i64} {
  func.func @mlp_kernel(%arg0: i32, %arg1: memref<8x784xf32, #tpu.memory_space<vmem>>, %arg2: memref<784x128xbf16, #tpu.memory_space<vmem>>, %arg3: memref<1x128xf32, #tpu.memory_space<vmem>>, %arg4: memref<128x64xbf16, #tpu.memory_space<vmem>>, %arg5: memref<1x64xf32, #tpu.memory_space<vmem>>, %arg6: memref<64x10xbf16, #tpu.memory_space<vmem>>, %arg7: memref<1x10xf32, #tpu.memory_space<vmem>>, %arg8: memref<8x10xf32, #tpu.memory_space<vmem>>) attributes {dimension_semantics = [#tpu.dimension_semantics<parallel>], iteration_bounds = array<i64: 1>, scalar_prefetch = 0 : i64, scratch_operands = 0 : i64, tpu.core_type = #tpu.core_type<tc>, window_params = [{transform_indices = @transform_0, window_bounds = array<i64: 8, 784>}, {pipeline_mode = #tpu.pipeline_mode<synchronous>, transform_indices = @transform_1, window_bounds = array<i64: 784, 128>}, {pipeline_mode = #tpu.pipeline_mode<synchronous>, transform_indices = @transform_2, window_bounds = array<i64: 1, 128>}, {pipeline_mode = #tpu.pipeline_mode<synchronous>, transform_indices = @transform_3, window_bounds = array<i64: 128, 64>}, {pipeline_mode = #tpu.pipeline_mode<synchronous>, transform_indices = @transform_4, window_bounds = array<i64: 1, 64>}, {pipeline_mode = #tpu.pipeline_mode<synchronous>, transform_indices = @transform_5, window_bounds = array<i64: 64, 10>}, {pipeline_mode = #tpu.pipeline_mode<synchronous>, transform_indices = @transform_6, window_bounds = array<i64: 1, 10>}, {transform_indices = @transform_7, window_bounds = array<i64: 8, 10>}]} {
    %c0 = arith.constant 0 : index
    %c0_0 = arith.constant 0 : index
    %0 = vector.load %arg1[%c0, %c0_0] : memref<8x784xf32, #tpu.memory_space<vmem>>, vector<8x784xf32>
    %1 = arith.truncf %0 : vector<8x784xf32> to vector<8x784xbf16>
    %c0_1 = arith.constant 0 : index
    %c0_2 = arith.constant 0 : index
    %2 = vector.load %arg2[%c0_1, %c0_2] : memref<784x128xbf16, #tpu.memory_space<vmem>>, vector<784x128xbf16>
    %cst = arith.constant dense<0.000000e+00> : vector<8x128xf32>
    %3 = tpu.matmul %1, %2, %cst {dimension_numbers = #tpu.dot_dimension_numbers<[1], [0], [0], [1], [0, 0, 1, 1], [], []>} : vector<8x784xbf16>, vector<784x128xbf16>, vector<8x128xf32> -> vector<8x128xf32>
    %c0_3 = arith.constant 0 : index
    %c0_4 = arith.constant 0 : index
    %4 = vector.load %arg3[%c0_3, %c0_4] : memref<1x128xf32, #tpu.memory_space<vmem>>, vector<1x128xf32>
    %5 = vector.broadcast %4 : vector<1x128xf32> to vector<8x128xf32>
    %6 = arith.addf %3, %5 : vector<8x128xf32>
    %cst_5 = arith.constant 0.000000e+00 : f32
    %7 = vector.broadcast %cst_5 : f32 to vector<8x128xf32>
    %8 = arith.maximumf %6, %7 : vector<8x128xf32>
    %9 = arith.truncf %8 : vector<8x128xf32> to vector<8x128xbf16>
    %c0_6 = arith.constant 0 : index
    %c0_7 = arith.constant 0 : index
    %10 = vector.load %arg4[%c0_6, %c0_7] : memref<128x64xbf16, #tpu.memory_space<vmem>>, vector<128x64xbf16>
    %cst_8 = arith.constant dense<0.000000e+00> : vector<8x64xf32>
    %11 = tpu.matmul %9, %10, %cst_8 {dimension_numbers = #tpu.dot_dimension_numbers<[1], [0], [0], [1], [0, 0, 1, 1], [], []>} : vector<8x128xbf16>, vector<128x64xbf16>, vector<8x64xf32> -> vector<8x64xf32>
    %c0_9 = arith.constant 0 : index
    %c0_10 = arith.constant 0 : index
    %12 = vector.load %arg5[%c0_9, %c0_10] : memref<1x64xf32, #tpu.memory_space<vmem>>, vector<1x64xf32>
    %13 = vector.broadcast %12 : vector<1x64xf32> to vector<8x64xf32>
    %14 = arith.addf %11, %13 : vector<8x64xf32>
    %cst_11 = arith.constant 0.000000e+00 : f32
    %15 = vector.broadcast %cst_11 : f32 to vector<8x64xf32>
    %16 = arith.maximumf %14, %15 : vector<8x64xf32>
    %17 = arith.truncf %16 : vector<8x64xf32> to vector<8x64xbf16>
    %c0_12 = arith.constant 0 : index
    %c0_13 = arith.constant 0 : index
    %18 = vector.load %arg6[%c0_12, %c0_13] : memref<64x10xbf16, #tpu.memory_space<vmem>>, vector<64x10xbf16>
    %cst_14 = arith.constant dense<0.000000e+00> : vector<8x10xf32>
    %19 = tpu.matmul %17, %18, %cst_14 {dimension_numbers = #tpu.dot_dimension_numbers<[1], [0], [0], [1], [0, 0, 1, 1], [], []>} : vector<8x64xbf16>, vector<64x10xbf16>, vector<8x10xf32> -> vector<8x10xf32>
    %c0_15 = arith.constant 0 : index
    %c0_16 = arith.constant 0 : index
    %20 = vector.load %arg7[%c0_15, %c0_16] : memref<1x10xf32, #tpu.memory_space<vmem>>, vector<1x10xf32>
    %21 = vector.broadcast %20 : vector<1x10xf32> to vector<8x10xf32>
    %22 = arith.addf %19, %21 : vector<8x10xf32>
    %cst_17 = arith.constant dense<0xFF800000> : vector<8xf32>
    %23 = vector.multi_reduction <maximumf>, %22, %cst_17 [1] : vector<8x10xf32> to vector<8xf32>
    %24 = vector.shape_cast %23 : vector<8xf32> to vector<8x1xf32>
    %25 = vector.broadcast %24 : vector<8x1xf32> to vector<8x10xf32>
    %26 = arith.subf %22, %25 : vector<8x10xf32>
    %27 = math.exp %26 : vector<8x10xf32>
    %cst_18 = arith.constant dense<0.000000e+00> : vector<8xf32>
    %28 = vector.multi_reduction <add>, %27, %cst_18 [1] : vector<8x10xf32> to vector<8xf32>
    %29 = vector.shape_cast %28 : vector<8xf32> to vector<8x1xf32>
    %30 = tpu.reciprocal %29 {approx = true} : vector<8x1xf32> -> vector<8x1xf32>
    %31 = vector.broadcast %30 : vector<8x1xf32> to vector<8x10xf32>
    %32 = arith.mulf %27, %31 : vector<8x10xf32>
    %c0_19 = arith.constant 0 : index
    %c0_20 = arith.constant 0 : index
    %33 = vector.load %arg8[%c0_19, %c0_20] : memref<8x10xf32, #tpu.memory_space<vmem>>, vector<8x10xf32>
    tpu.vector_store %arg8[%c0_19, %c0_20], %32 {strides = array<i32>} : memref<8x10xf32, #tpu.memory_space<vmem>>, vector<8x10xf32>,
    return
  }
  func.func @transform_0(%arg0: i32) -> (i32, i32) {
    %c0_i32 = arith.constant 0 : i32
    %c0_i32_0 = arith.constant 0 : i32
    return %arg0, %c0_i32 : i32, i32
  }
  func.func @transform_1(%arg0: i32) -> (i32, i32) {
    %c0_i32 = arith.constant 0 : i32
    %c0_i32_0 = arith.constant 0 : i32
    %c0_i32_1 = arith.constant 0 : i32
    return %c0_i32, %c0_i32_0 : i32, i32
  }
  func.func @transform_2(%arg0: i32) -> (i32, i32) {
    %c0_i32 = arith.constant 0 : i32
    %c0_i32_0 = arith.constant 0 : i32
    %c0_i32_1 = arith.constant 0 : i32
    return %c0_i32, %c0_i32_0 : i32, i32
  }
  func.func @transform_3(%arg0: i32) -> (i32, i32) {
    %c0_i32 = arith.constant 0 : i32
    %c0_i32_0 = arith.constant 0 : i32
    %c0_i32_1 = arith.constant 0 : i32
    return %c0_i32, %c0_i32_0 : i32, i32
  }
  func.func @transform_4(%arg0: i32) -> (i32, i32) {
    %c0_i32 = arith.constant 0 : i32
    %c0_i32_0 = arith.constant 0 : i32
    %c0_i32_1 = arith.constant 0 : i32
    return %c0_i32, %c0_i32_0 : i32, i32
  }
  func.func @transform_5(%arg0: i32) -> (i32, i32) {
    %c0_i32 = arith.constant 0 : i32
    %c0_i32_0 = arith.constant 0 : i32
    %c0_i32_1 = arith.constant 0 : i32
    return %c0_i32, %c0_i32_0 : i32, i32
  }
  func.func @transform_6(%arg0: i32) -> (i32, i32) {
    %c0_i32 = arith.constant 0 : i32
    %c0_i32_0 = arith.constant 0 : i32
    %c0_i32_1 = arith.constant 0 : i32
    return %c0_i32, %c0_i32_0 : i32, i32
  }
  func.func @transform_7(%arg0: i32) -> (i32, i32) {
    %c0_i32 = arith.constant 0 : i32
    %c0_i32_0 = arith.constant 0 : i32
    return %arg0, %c0_i32 : i32, i32
  }
}

</mosaic_0001>

<bundles_post_ra>
// kernel: tpu_custom_call.1
= control target key start
LH: loop header
LB: loop body
LE: loop exit
PB: predicated region body
PF: predicated region fallthrough
CT: control target
= control target key end

     0   :  { %12 = vsyncpa [#allocation3], 0  ;;  %s1308_s0 = inlined_call_operand.vmem [shape: f32[8,784], index: 0, kind: input, shape index: {}]   ;;  %s1309_s1 = inlined_call_operand.hbm [shape: bf16[784,128], index: 1, kind: input, shape index: {}]   ;;  %s1310_s2 = inlined_call_operand.vmem [shape: f32[1,128], index: 2, kind: input, shape index: {}]   ;;  %s1311_s3 = inlined_call_operand.vmem [shape: bf16[128,64], index: 3, kind: input, shape index: {}]   ;;  %s1312_s4 = inlined_call_operand.vmem [shape: f32[1,64], index: 4, kind: input, shape index: {}]   ;;  %s1313_s5 = inlined_call_operand.vmem [shape: bf16[64,10], index: 5, kind: input, shape index: {}]   ;;  %s1314_s6 = inlined_call_operand.vmem [shape: f32[1,10], index: 6, kind: input, shape index: {}]   ;;  %s1315_s7 = inlined_call_operand.hbm [shape: f32[8,10], index: 7, kind: output, shape index: {}]  }
   0x1   :  { %13 = vsyncpa [#allocation4], 0  ;;  %s1150_s24 = smov [#allocation2]   ;;  %s1102_s28 = scalar_lea.hbm %s1309_s1, 6272 }
   0x2   :  { %s21_s25 = sshll.u32 %s1150_s24, 4  ;;  %p1103_p0 = scmp.ne.s32.totalorder %s1309_s1, %s1102_s28  ;;  %s22_s25 = int_to_ptr.vmem [resolvable:$true] %s21_s25 }
   0x3   :  { %p1106_p1 = scmp.lt.u32.totalorder %s1102_s28, %s1309_s1 }
   0x5   :  { %p1108_p2 = pnand %p1106_p1, %p1103_p0 }
   0x7   :  { %1111 = shalt.err (!%p1108_p2)
}
   0x8   :  { %s1112_s10 = scalar_lea.vmem %s22_s25, 6272  ;;  %p1117_p4 = scmp.lt.s32.totalorder %s22_s25, %s22_s25 }
   0x9   :  { %p1113_p3 = scmp.ne.s32.totalorder %s22_s25, %s1112_s10  ;;  %p1118_p5 = scmp.lt.s32.totalorder %s1112_s10, %s1112_s10 }
   0xb   :  { %p1119_p6 = por %p1118_p5, %p1117_p4 }
   0xd   :  { %p1120_p7 = pnand %p1119_p6, %p1113_p3 }
   0xf   :  { %1123 = shalt.err (!%p1120_p7)
}
  0x10   :  { %s1151_s11 = smov 64   ;;  %s1152_s12 = smov 4  }
  0x11   :  { %27 = dma.hbm_to_vmem [thread:$0]  %s1309_s1, 6272, %s22_s25, [#allocation3], %s1151_s11, %s1151_s11, %s1152_s12  }
  0x12   :  { %1146 = dma.done.wait [#allocation3], 6272  }
  0x13   :  { %1147 = vsyncadd [#allocation3], 4294961024  ;;  %v1037_v0 = vld [vmem:[#allocation2 + $0x40] sm:$0xff]   ;;  %v1041_v4 = vld [vmem:[#allocation2 + $0x48] sm:$0xff]   ;;  %v1153_v44 = vmov 0.0   ;;  %vm1154_vm0 = vmmov 0  }
  0x14   :  { %v1038_v1 = vld [vmem:[#allocation2] sm:$0xff]   ;;  %911 = vmatprep.subr.bf16.mxu0 %v1037_v0  ;;  %v1042_v5 = vld [vmem:[#allocation2 + $0x8] sm:$0xff]   ;;  %v1045_v8 = vld [vmem:[#allocation2 + $0x50] sm:$0xff]   ;;  %vm455_vm1 = vcmask 130048   ;;  %vm773_vm2 = vcmask 523264   ;;  %vm817_vm3 = vcmask 80896  }
  0x15   :  { %v1039_v2 = vld [vmem:[#allocation2 + $0xc0] sm:$0xff]   ;;  %912 = vmatpush3.bf16.msra.mxu0 %v1038_v1  ;;  %v1043_v6 = vld [vmem:[#allocation2 + $0xc8] sm:$0xff]   ;;  %v1046_v9 = vld [vmem:[#allocation2 + $0x10] sm:$0xff]  }
  0x16   :  { %v1040_v3 = vld [vmem:[#allocation2 + $0x80] sm:$0xff]   ;;  %933 = vmatprep.subr.bf16.mxu1 %v1039_v2  ;;  %913 = vmatprep.subr.bf16.mxu0 %v1041_v4  ;;  %v1044_v7 = vld [vmem:[#allocation2 + $0x88] sm:$0xff]   ;;  %v1047_v10 = vld [vmem:[#allocation2 + $0xd0] sm:$0xff]  }
  0x17   :  { %934 = vmatpush3.bf16.msra.mxu1 %v1040_v3  ;;  %v1048_v11 = vld [vmem:[#allocation2 + $0x90] sm:$0xff]   ;;  %v1049_v12 = vld [vmem:[#allocation2 + $0x58] sm:$0xff]   ;;  %v1053_v16 = vld [vmem:[#allocation2 + $0x60] sm:$0xff]  }
  0x18   :  { %935 = vmatprep.subr.bf16.mxu1 %v1043_v6  ;;  %v1050_v13 = vld [vmem:[#allocation2 + $0x18] sm:$0xff]   ;;  %v1054_v17 = vld [vmem:[#allocation2 + $0x20] sm:$0xff]   ;;  %v1057_v20 = vld [vmem:[#allocation2 + $0x68] sm:$0xff]  }
  0x19   :  { %914 = vmatpush3.bf16.msra.mxu0 %v1042_v5  ;;  %v1051_v14 = vld [vmem:[#allocation2 + $0xd8] sm:$0xff]   ;;  %v1055_v18 = vld [vmem:[#allocation2 + $0xe0] sm:$0xff]   ;;  %v1058_v21 = vld [vmem:[#allocation2 + $0x28] sm:$0xff]  }
  0x1a   :  { %915 = vmatprep.subr.bf16.mxu0 %v1045_v8  ;;  %v1052_v15 = vld [vmem:[#allocation2 + $0x98] sm:$0xff]   ;;  %v1056_v19 = vld [vmem:[#allocation2 + $0xa0] sm:$0xff]   ;;  %v1059_v22 = vld [vmem:[#allocation2 + $0xe8] sm:$0xff]  }
  0x1b   :  { %936 = vmatpush3.bf16.msra.mxu1 %v1044_v7  ;;  %v1060_v23 = vld [vmem:[#allocation2 + $0xa8] sm:$0xff]   ;;  %v1061_v24 = vld [vmem:[#allocation2 + $0x70] sm:$0xff]   ;;  %v1065_v28 = vld [vmem:[#allocation2 + $0x78] sm:$0xff]  }
  0x1c   :  { %937 = vmatprep.subr.bf16.mxu1 %v1047_v10  ;;  %v1062_v25 = vld [vmem:[#allocation2 + $0x30] sm:$0xff]   ;;  %v1066_v29 = vld [vmem:[#allocation2 + $0x38] sm:$0xff]   ;;  %v43_v31 = vld [vmem:[%s1308_s0 + $0x8] sm:$0xff] }
  0x1d   :  { %916 = vmatpush3.bf16.msra.mxu0 %v1046_v9  ;;  %v1063_v26 = vld [vmem:[#allocation2 + $0xf0] sm:$0xff]   ;;  %v1067_v30 = vld [vmem:[#allocation2 + $0xf8] sm:$0xff]   ;;  %v50_v32 = vpack.c.bf16 %v43_v31, %v43_v31  ;;  %v42_v34 = vld [vmem:[%s1308_s0] sm:$0xff] }
  0x1e   :  { %917 = vmatprep.subr.bf16.mxu0 %v1049_v12  ;;  %v1064_v27 = vld [vmem:[#allocation2 + $0xb0] sm:$0xff]   ;;  %v1068_v33 = vld [vmem:[#allocation2 + $0xb8] sm:$0xff]   ;;  %v49_v35 = vpack.c.bf16 %v42_v34, %v42_v34  ;;  %v1069_v36 = vld [vmem:[#allocation2 + $0x140] sm:$0xff]  }
  0x1f   :  { %938 = vmatpush3.bf16.msra.mxu1 %v1048_v11  ;;  %v45_v37 = vld [vmem:[%s1308_s0 + $0x18] sm:$0xff]  ;;  %491 = vmatprep.mubr.bf16.mxu0 %v50_v32  ;;  %v1070_v39 = vld [vmem:[#allocation2 + $0x100] sm:$0xff]   ;;  %v44_v40 = vld [vmem:[%s1308_s0 + $0x10] sm:$0xff] }
  0x20   :  { %939 = vmatprep.subr.bf16.mxu1 %v1051_v14  ;;  %v52_v38 = vpack.c.bf16 %v45_v37, %v45_v37  ;;  %v51_v41 = vpack.c.bf16 %v44_v40, %v44_v40  ;;  %v1071_v42 = vld [vmem:[#allocation2 + $0x148] sm:$0xff]   ;;  %v1073_v45 = vld [vmem:[#allocation2 + $0x150] sm:$0xff]   ;;  %v1075_v47 = vld [vmem:[#allocation2 + $0x158] sm:$0xff]  }
  0x21   :  { %918 = vmatpush3.bf16.msra.mxu0 %v1050_v13  ;;  %v1072_v43 = vld [vmem:[#allocation2 + $0x108] sm:$0xff]   ;;  %v1074_v46 = vld [vmem:[#allocation2 + $0x110] sm:$0xff]   ;;  %v1076_v48 = vld [vmem:[#allocation2 + $0x118] sm:$0xff]  }
  0x22   :  { %919 = vmatprep.subr.bf16.mxu0 %v1053_v16  ;;  %531 = vmatprep.mubr.bf16.mxu1 %v52_v38  ;;  %v1077_v49 = vld [vmem:[#allocation2 + $0x160] sm:$0xff]   ;;  %v1079_v51 = vld [vmem:[#allocation2 + $0x168] sm:$0xff]   ;;  %v1081_v55 = vld [vmem:[#allocation2 + $0x170] sm:$0xff]  }
  0x23   :  { %940 = vmatpush3.bf16.msra.mxu1 %v1052_v15  ;;  %v1078_v50 = vld [vmem:[#allocation2 + $0x120] sm:$0xff]   ;;  %v1080_v52 = vld [vmem:[#allocation2 + $0x128] sm:$0xff]   ;;  %v48_v57 = vld [vmem:[%s1308_s0 + $0x30] sm:$0xff] }
  0x24   :  { %941 = vmatprep.subr.bf16.mxu1 %v1055_v18  ;;  %v1085_v53 = vld [vmem:[#allocation2 + $0x180] sm:$0xff]   ;;  %v47_v54 = vld [vmem:[%s1308_s0 + $0x28] sm:$0xff]  ;;  %v55_v58 = vpack.c.bf16 %v48_v57, %v48_v57  ;;  %v1082_v59 = vld [vmem:[#allocation2 + $0x130] sm:$0xff]  }
  0x25   :  { %920 = vmatpush3.bf16.msra.mxu0 %v1054_v17  ;;  %v54_v56 = vpack.c.bf16 %v47_v54, %v47_v54  ;;  %v1083_v60 = vld [vmem:[#allocation2 + $0x178] sm:$0xff]   ;;  %v46_v62 = vld [vmem:[%s1308_s0 + $0x20] sm:$0xff]  ;;  %v1087_v1 = vld [vmem:[%s1311_s3 + $0x8] sm:$0xff]  }
  0x26   :  { %921 = vmatprep.subr.bf16.mxu0 %v1057_v20  ;;  %v1084_v61 = vld [vmem:[#allocation2 + $0x138] sm:$0xff]   ;;  %v53_v63 = vpack.c.bf16 %v46_v62, %v46_v62  ;;  %v1086_v0 = vld [vmem:[%s1311_s3] sm:$0xff]   ;;  %v1088_v2 = vld [vmem:[%s1311_s3 + $0x10] sm:$0xff]  }
  0x27   :  { %942 = vmatpush3.bf16.msra.mxu1 %v1056_v19  ;;  %v1089_v3 = vld [vmem:[%s1311_s3 + $0x18] sm:$0xff]   ;;  %v1090_v4 = vld [vmem:[%s1311_s3 + $0x20] sm:$0xff]   ;;  %v1091_v5 = vld [vmem:[%s1311_s3 + $0x28] sm:$0xff]  }
  0x28   :  { %943 = vmatprep.subr.bf16.mxu1 %v1059_v22  ;;  %v1092_v6 = vld [vmem:[%s1311_s3 + $0x30] sm:$0xff]   ;;  %v1093_v7 = vld [vmem:[%s1311_s3 + $0x38] sm:$0xff]   ;;  %v1094_v8 = vld [vmem:[%s1313_s5] sm:$0xff]  }
  0x29   :  { %922 = vmatpush3.bf16.msra.mxu0 %v1058_v21  ;;  %v1095_v9 = vld [vmem:[%s1313_s5 + $0x8] sm:$0xff]   ;;  %v845_v11 = vld [vmem:[%s1310_s2] ss:$0 sm:$0xff]  ;;  %v1097_v37 = vld [vmem:[%s1313_s5 + $0x18] sm:$0xff]  }
  0x2a   :  { %923 = vmatprep.subr.bf16.mxu0 %v1061_v24  ;;  %v896_v38 = vld [vmem:[%s1312_s4] ss:$0 sm:$0xff]  ;;  %s1155_s4 = smov [#allocation5]  }
  0x2b   :  { %944 = vmatpush3.bf16.msra.mxu1 %v1060_v23 }
  0x2c   :  { %945 = vmatprep.subr.bf16.mxu1 %v1063_v26 }
  0x2d   :  { %924 = vmatpush3.bf16.msra.mxu0 %v1062_v25 }
  0x2e   :  { %925 = vmatprep.subr.bf16.mxu0 %v1065_v28 }
  0x2f   :  { %946 = vmatpush3.bf16.msra.mxu1 %v1064_v27 }
  0x30   :  { %947 = vmatprep.subr.bf16.mxu1 %v1067_v30 }
  0x31   :  { %926 = vmatpush3.bf16.msra.mxu0 %v1066_v29 }
  0x32   :  { %955 = vmatprep.subr.bf16.mxu0 %v1069_v36  ;;  %v1096_v36 = vld [vmem:[%s1313_s5 + $0x10] sm:$0xff]   ;;  %s836_s5 = sshll.u32 %s1155_s4, 4  ;;  %s837_s5 = int_to_ptr.vmem [resolvable:$true] %s836_s5 }
  0x33   :  { %948 = vmatpush3.bf16.msra.mxu1 %v1068_v33  ;;  %p1129_p9 = scmp.lt.s32.totalorder %s837_s5, %s837_s5 }
  0x34   :  { %492 = vmatmul.mubr.bf16.vlgmr.msra.gmra.mrb[0].mxu0 %v49_v35  ;;  %993 = vmatprep.subr.bf16.mxu1 %v1153_v44 }
  0x35   :  { %956 = vmatpush3.bf16.msra.mxu0 %v1070_v39  ;;  %571 = vmatprep.mubr.bf16.mxu0 %v54_v56 }
  0x36   :  { %532 = vmatmul.mubr.bf16.vlgmr.msra.gmra.mrb[0].mxu1 %v51_v41  ;;  %957 = vmatprep.subr.bf16.mxu0 %v1071_v42 }
  0x37   :  { %995 = vmatprep.mubr.msk.bf16.mxu1 %vm1154_vm0, %v1153_v44  ;;  %994 = vmatpush3.bf16.msra.mxu1 %v1085_v53 }
  0x38   :  { %999 = vmatprep.subr.bf16.mxu1 %v1153_v44 }
  0x39   :  { %958 = vmatpush3.bf16.msra.mxu0 %v1072_v43 }
  0x3a   :  { %959 = vmatprep.subr.bf16.mxu0 %v1073_v45 }
  0x3d   :  { %960 = vmatpush3.bf16.msra.mxu0 %v1074_v46 }
  0x3e   :  { %961 = vmatprep.subr.bf16.mxu0 %v1075_v47  ;;  %996 = vmatmul.mubr.msk.bf16.vlgmr.msra.gmra.mrb[4].mxu1 %vm455_vm1, %v55_v58 }
  0x3f   :  { %1015 = vmatprep.mubr.msk.bf16.mxu1 %vm1154_vm0, %v1153_v44  ;;  %1000 = vmatpush3.bf16.msra.mxu1 %v1086_v0 }
  0x40   :  { %1001 = vmatprep.subr.bf16.mxu1 %v1153_v44 }
  0x41   :  { %962 = vmatpush3.bf16.msra.mxu0 %v1076_v48 }
  0x42   :  { %963 = vmatprep.subr.bf16.mxu0 %v1077_v49 }
  0x43   :  { %1002 = vmatpush3.bf16.msra.mxu1 %v1087_v1 }
  0x44   :  { %1003 = vmatprep.subr.bf16.mxu1 %v1153_v44 }
  0x45   :  { %964 = vmatpush3.bf16.msra.mxu0 %v1078_v50 }
  0x46   :  { %965 = vmatprep.subr.bf16.mxu0 %v1079_v51 }
  0x47   :  { %1004 = vmatpush3.bf16.msra.mxu1 %v1088_v2 }
  0x48   :  { %1005 = vmatprep.subr.bf16.mxu1 %v1153_v44 }
  0x49   :  { %966 = vmatpush3.bf16.msra.mxu0 %v1080_v52 }
  0x4a   :  { %967 = vmatprep.subr.bf16.mxu0 %v1081_v55 }
  0x4b   :  { %1006 = vmatpush3.bf16.msra.mxu1 %v1089_v3 }
  0x4c   :  { %1007 = vmatprep.subr.bf16.mxu1 %v1153_v44 }
  0x4d   :  { %968 = vmatpush3.bf16.msra.mxu0 %v1082_v59 }
  0x4e   :  { %969 = vmatprep.subr.bf16.mxu0 %v1083_v60 }
  0x4f   :  { %1008 = vmatpush3.bf16.msra.mxu1 %v1090_v4 }
  0x50   :  { %1009 = vmatprep.subr.bf16.mxu1 %v1153_v44 }
  0x51   :  { %970 = vmatpush3.bf16.msra.mxu0 %v1084_v61 }
  0x52   :  { %1019 = vmatprep.subr.bf16.mxu0 %v1153_v44 }
  0x53   :  { %1010 = vmatpush3.bf16.msra.mxu1 %v1091_v5 }
  0x54   :  { %572 = vmatmul.mubr.bf16.vlgmr.msra.gmra.mrb[4].mxu0 %v53_v63  ;;  %1011 = vmatprep.subr.bf16.mxu1 %v1153_v44 }
  0x55   :  { %1027 = vmatprep.mubr.msk.bf16.mxu0 %vm1154_vm0, %v1153_v44  ;;  %1020 = vmatpush3.bf16.msra.mxu0 %v1094_v8 }
  0x56   :  { %1021 = vmatprep.subr.bf16.mxu0 %v1153_v44 }
  0x57   :  { %1012 = vmatpush3.bf16.msra.mxu1 %v1092_v6 }
  0x58   :  { %1013 = vmatprep.subr.bf16.mxu1 %v1153_v44 }
  0x59   :  { %1022 = vmatpush3.bf16.msra.mxu0 %v1095_v9 }
  0x5a   :  { %1023 = vmatprep.subr.bf16.mxu0 %v1153_v44 }
  0x5b   :  { %1014 = vmatpush3.bf16.msra.mxu1 %v1093_v7 }
  0x5d   :  { %1024 = vmatpush3.bf16.msra.mxu0 %v1096_v36 }
  0x5e   :  { %1025 = vmatprep.subr.bf16.mxu0 %v1153_v44  ;;  %v905_v44 = vld [vmem:[%s1314_s6] ss:$0 sm:$0xff]  ;;  %s1124_s6 = scalar_lea.vmem %s837_s5, 128 }
  0x5f   :  { %p1125_p8 = scmp.ne.s32.totalorder %s837_s5, %s1124_s6  ;;  %p1130_p10 = scmp.lt.s32.totalorder %s1124_s6, %s1124_s6 }
  0x61   :  { %1026 = vmatpush3.bf16.msra.mxu0 %v1097_v37  ;;  %p1131_p11 = por %p1130_p10, %p1129_p9 }
  0x63   :  { %p1132_p12 = pnand %p1131_p11, %p1125_p8 }
 0x107   :  { %v927_v10 = vpop.f32.mrb[0].mxu0 }
 0x108   :  { %v928_v12 = vpop.f32.mrb[1].mxu0 }
 0x109   :  { %v929_v13 = vadd.f32 %v928_v12, %v927_v10  ;;  %v930_v14 = vpop.f32.mrb[2].mxu0  ;;  %v949_v15 = vpop.f32.mrb[0].mxu1 }
 0x10a   :  { %v931_v16 = vpop.f32.mrb[3].mxu0  ;;  %v950_v18 = vpop.f32.mrb[1].mxu1 }
 0x10b   :  { %v494_v17 = vadd.f32 %v929_v13, %v845_v11  ;;  %v951_v19 = vadd.f32 %v950_v18, %v949_v15  ;;  %v952_v20 = vpop.f32.mrb[2].mxu1 }
 0x10c   :  { %v953_v21 = vpop.f32.mrb[3].mxu1 }
 0x10d   :  { %v534_v22 = vadd.f32 %v951_v19, %v494_v17 }
 0x111   :  { %v613_v23 = vpop.f32.mrb[4].mxu1 }
 0x112   :  { %v997_v24 = vpop.f32.mrb[5].mxu1 }
 0x113   :  { %v616_v25 = vpop.f32.mrb[6].mxu1 }
 0x114   :  { %v998_v26 = vpop.f32.mrb[7].mxu1 }
 0x127   :  { %v971_v27 = vpop.f32.mrb[4].mxu0 }
 0x128   :  { %v972_v28 = vpop.f32.mrb[5].mxu0 }
 0x129   :  { %v973_v29 = vadd.f32 %v972_v28, %v971_v27  ;;  %v974_v30 = vpop.f32.mrb[6].mxu0 }
 0x12a   :  { %v975_v31 = vpop.f32.mrb[7].mxu0 }
 0x12b   :  { %v574_v32 = vadd.f32 %v973_v29, %v534_v22 }
 0x12d   :  { %v614_v33 = vadd.f32 %v613_v23, %v574_v32 }
 0x12f   :  { %v619_v34 = vmax.f32 %v614_v33, 0.0 }
 0x131   :  { %v620_v35 = vpack.c.bf16 %v619_v34, %v619_v34 }
 0x133   :  { %1016 = vmatmul.mubr.bf16.vlgmr.msra.gmra.mrb[8].mxu1 %v620_v35 }
 0x206   :  { %v726_v39 = vpop.f32.mrb[8].mxu1 }
 0x207   :  { %v727_v40 = vadd.f32 %v896_v38, %v726_v39  ;;  %v1017_v41 = vpop.f32.mrb[9].mxu1 }
 0x208   :  { %v729_v42 = vpop.f32.mrb[10].mxu1 }
 0x209   :  { %v732_v43 = vmax.f32 %v727_v40, 0.0  ;;  %v1018_v45 = vpop.f32.mrb[11].mxu1 }
 0x20b   :  { %v733_v46 = vpack.c.bf16 %v732_v43, %v732_v43 }
 0x20d   :  { %1028 = vmatmul.mubr.msk.bf16.vlgmr.msra.gmra.mrb[8].mxu0 %vm773_vm2, %v733_v46 }
 0x2e0   :  { %v811_v47 = vpop.f32.mrb[8].mxu0 }
 0x2e1   :  { %v812_v48 = vadd.f32 %v905_v44, %v811_v47  ;;  %v1029_v49 = vpop.f32.mrb[9].mxu0 }
 0x2e2   :  { %v814_v50 = vpop.f32.mrb[10].mxu0 }
 0x2e3   :  { %v1030_v51 = vpop.f32.mrb[11].mxu0  ;;  %v818_v52 = vsel %vm817_vm3, %v812_v48, -inf }
 0x2e4   :  { %819 = vmax.xlane.f32.xlu0 %v818_v52 }
 0x371   :  { %v820_v53 = vpop.xlane.xlu0 %819 }
 0x372   :  { %v821_v54 = vsub.f32 %v812_v48, %v820_v53 }
 0x374   :  { %v822_v55 = vmul.f32 1.442695, %v821_v54 }
 0x376   :  { %1098 = vpow2.f32 %v822_v55 }
 0x380   :  { %v1099_v56 = vpop.eup %1098 }
 0x381   :  { %v824_v57 = vsel %vm817_vm3, %v1099_v56, 0.0 }
 0x382   :  { %825 = vadd.xlane.f32.xlu0 %v824_v57 }
 0x40f   :  { %v826_v58 = vpop.xlane.xlu0 %825 }
 0x410   :  { %1100 = vrcp.f32 %v826_v58 }
 0x41a   :  { %v1101_v59 = vpop.eup %1100 }
 0x41b   :  { %v828_v60 = vmul.f32 %v1101_v59, %v1099_v56 }
 0x41d   :  { %829 = vst.msk [vmem:[#allocation5] sm:$0xff] %vm817_vm3, %v828_v60 }
 0x41e   :  { %1135 = shalt.err (!%p1132_p12)
}
 0x41f   :  { %s1136_s9 = scalar_lea.hbm %s1315_s7, 128 }
 0x420   :  { %p1137_p13 = scmp.ne.s32.totalorder %s1315_s7, %s1136_s9  ;;  %p1140_p0 = scmp.lt.u32.totalorder %s1136_s9, %s1315_s7 }
 0x422   :  { %p1142_p1 = pnand %p1140_p0, %p1137_p13 }
 0x424   :  { %1145 = shalt.err (!%p1142_p1)
}
 0x425   :  { %839 = dma.vmem_to_hbm [thread:$0]  %s837_s5, 128, %s1315_s7, [#allocation4]  }
 0x426   :  { %1148 = dma.done.wait [#allocation4], 128  }
 0x427   :  { %1149 = vsyncadd [#allocation4], 4294967168 }
 0x428   :  { %843 = vsyncpa [#allocation3], 1 }
 0x429   :  { %844 = vsyncpa [#allocation4], 1 }

</bundles_post_ra>
